<compile_context>
chip_gen: v7x
topology: tpu7x:2x2x1
jax: 0.10.0
libtpu: 0.0.40
codegen_flags: <defaults>
</compile_context>

<pallas_src>
import jax
import jax.numpy as jnp
from jax.experimental import pallas as pl
from jax.experimental.pallas import tpu as pltpu


# ---------------------------------------------------------------------------
# Kernel
# ---------------------------------------------------------------------------
def _linear_kernel(x_ref, wt_ref, b_ref, o_ref, acc_ref):
    # x_ref : (tm, tk) bf16   wt_ref : (tk, tn) bf16
    # b_ref : (1,  tn) f32    o_ref  : (tm, tn) f32   acc_ref : (tm, tn) f32 scratch
    k = pl.program_id(2)

    @pl.when(k == 0)
    def _init():
        acc_ref[...] = jnp.zeros_like(acc_ref)

    acc_ref[...] += jnp.dot(x_ref[...], wt_ref[...],
                            preferred_element_type=jnp.float32)

    @pl.when(k == pl.num_programs(2) - 1)
    def _finalize():
        # Bias added exactly once per output tile (not per K step).
        o_ref[...] = (acc_ref[...] + b_ref[...]).astype(o_ref.dtype)


# ---------------------------------------------------------------------------
# Tiling helpers
# ---------------------------------------------------------------------------
def _round_up(v, m):
    return ((v + m - 1) // m) * m


# Base tiles: bf16 double-buffered footprint ~= 2*(tm*tk + tk*tn)*2B + (tm*tn)*4B*2
# ~= 3 MiB -> comfortably inside v7x's 32 MiB scoped / 64 MiB physical VMEM, and
# 128-aligned for the v5e 4x128x128 MXU (tn/tk also 256-aligned for v6e/v7x).
_TM, _TN, _TK = 256, 512, 512


def _choose_tiles(B, K, N):
    # M aligned to 16 (bf16 sublane packing); K/N lane-aligned to 128.
    tm = _TM if B > _TM else _round_up(max(B, 16), 16)
    tn = _TN if N > _TN else _round_up(max(N, 128), 128)
    tk = _TK if K > _TK else _round_up(max(K, 128), 128)
    Bp = _round_up(B, tm)
    Kp = _round_up(K, tk)
    Np = _round_up(N, tn)
    return Bp, Kp, Np, tm, tn, tk


def _linear_pallas_padded(x_p, wt_p, b_p, tm, tn, tk):
    """x_p:(Bp,Kp) bf16, wt_p:(Kp,Np) bf16, b_p:(1,Np) f32 -> (Bp,Np) f32."""
    Bp, Kp = x_p.shape
    Kp2, Np = wt_p.shape
    assert Kp == Kp2
    grid = (Bp // tm, Np // tn, Kp // tk)

    cost = pl.CostEstimate(
        flops=2 * Bp * Kp * Np,
        transcendentals=0,
        bytes_accessed=(x_p.size * 2 + wt_p.size * 2 + Bp * Np * 4 + Np * 4),
    )

    return pl.pallas_call(
        _linear_kernel,
        out_shape=jax.ShapeDtypeStruct((Bp, Np), jnp.float32),
        grid_spec=pltpu.PrefetchScalarGridSpec(
            num_scalar_prefetch=0,
            grid=grid,
            in_specs=[
                pl.BlockSpec((tm, tk), lambda i, j, k: (i, k)),   # x tile
                pl.BlockSpec((tk, tn), lambda i, j, k: (k, j)),   # W^T tile
                # NOTE: could add pipeline_mode=pl.Buffered(3) here if the K-axis
                # weight-stream DMA shows up as exposed latency in profiling.
                pl.BlockSpec((1, tn), lambda i, j, k: (0, j)),    # bias tile
            ],
            out_specs=pl.BlockSpec((tm, tn), lambda i, j, k: (i, j)),
            scratch_shapes=[pltpu.VMEM((tm, tn), jnp.float32)],
        ),
        compiler_params=pltpu.CompilerParams(
            dimension_semantics=("parallel", "parallel", "arbitrary"),
            vmem_limit_bytes=48 * 1024 * 1024,
        ),
        cost_estimate=cost,
    )(x_p, wt_p, b_p)


def linear_pallas(x, weight, bias, *, compute_dtype=jnp.bfloat16):
    """y = x @ weight.T + bias  (PyTorch nn.Linear semantics), tiled Pallas matmul.

    x:      (B, in_features)
    weight: (out_features, in_features)
    bias:   (out_features,)
    Inputs are cast to bf16 for the MXU; accumulation and bias add are f32.
    """
    B, K = x.shape
    N, K2 = weight.shape
    assert K == K2
    Bp, Kp, Np, tm, tn, tk = _choose_tiles(B, K, N)

    x_p = jnp.zeros((Bp, Kp), compute_dtype).at[:B, :K].set(x.astype(compute_dtype))
    wt_p = jnp.zeros((Kp, Np), compute_dtype).at[:K, :N].set(
        weight.astype(compute_dtype).T)
    b_p = jnp.zeros((1, Np), jnp.float32).at[0, :N].set(bias.astype(jnp.float32))

    out_p = _linear_pallas_padded(x_p, wt_p, b_p, tm, tn, tk)
    return out_p[:B, :N].astype(x.dtype)


# ---------------------------------------------------------------------------
# Module mirror
# ---------------------------------------------------------------------------
class SimpleNetPallas:
    """Mirror of the PyTorch simple_net: one Linear(input_size, output_size)."""

    # Below this weight size the pallas_call launch + pad/slice overhead dominates;
    # let plain XLA handle it unless the kernel path is explicitly forced.
    _PALLAS_MIN_WEIGHT_BYTES = 1 << 20  # 1 MiB

    def __init__(self, input_size, output_size, key, compute_dtype=jnp.bfloat16):
        kw, kb = jax.random.split(key)
        # Deterministic init mimicking PyTorch Linear's U(-1/sqrt(in), 1/sqrt(in)).
        bound = 1.0 / (float(input_size) ** 0.5)
        self.weight = jax.random.uniform(
            kw, (output_size, input_size), jnp.float32, -bound, bound)
        self.bias = jax.random.uniform(
            kb, (output_size,), jnp.float32, -bound, bound)

        self.K, self.N = input_size, output_size
        self.compute_dtype = compute_dtype

        # Weight prep hoisted out of the per-call path: transpose + pad + bf16 cast once.
        _, self.Kp, self.Np, _, self.tn, self.tk = _choose_tiles(1, input_size, output_size)
        self.wt_pad = jnp.zeros((self.Kp, self.Np), compute_dtype).at[
            :input_size, :output_size].set(self.weight.astype(compute_dtype).T)
        self.b_pad = jnp.zeros((1, self.Np), jnp.float32).at[0, :output_size].set(
            self.bias)

    def __call__(self, x, force_pallas=False):
        B, K = x.shape
        assert K == self.K
        weight_bytes = self.Kp * self.Np * 2
        if not force_pallas and weight_bytes < self._PALLAS_MIN_WEIGHT_BYTES:
            # Tiny problem (like the spec's 1->1 Linear): plain XLA dot wins.
            return x @ self.weight.T + self.bias

        # Per-call work: only x needs pad/cast (weight/bias were prepared in __init__).
        tm = _TM if B > _TM else _round_up(max(B, 16), 16)
        Bp = _round_up(B, tm)
        x_p = jnp.zeros((Bp, self.Kp), self.compute_dtype).at[:B, :K].set(
            x.astype(self.compute_dtype))
        out_p = _linear_pallas_padded(x_p, self.wt_pad, self.b_pad, tm, self.tn, self.tk)
        return out_p[:B, :self.N].astype(x.dtype)


# ---------------------------------------------------------------------------
# Self-test
# ---------------------------------------------------------------------------
if __name__ == "__main__":
    key = jax.random.PRNGKey(0)
    k_param, k_x, k_big = jax.random.split(key, 3)

    def _bf16_ref(x, w, b):
        # Faithful reference for the bf16-input / f32-accumulate kernel.
        return (x.astype(jnp.bfloat16).astype(jnp.float32)
                @ w.astype(jnp.bfloat16).astype(jnp.float32).T
                + b.astype(jnp.float32))

    # --- 1) The module as specified: Linear(1, 1), batch=8 (force the Pallas path). ---
    input_size, output_size, batch = 1, 1, 8
    net = SimpleNetPallas(input_size, output_size, k_param)
    x = jax.random.normal(k_x, (batch, input_size), jnp.float32)

    y = jax.block_until_ready(net(x, force_pallas=True))
    y_ref = _bf16_ref(x, net.weight, net.bias)
    assert y.shape == (batch, output_size)
    assert jnp.allclose(y, y_ref, atol=1e-3, rtol=1e-3)

    # Also exercise the small-shape XLA fallback path.
    y_small = jax.block_until_ready(net(x))
    y_small_ref = x @ net.weight.T + net.bias
    assert jnp.allclose(y_small, y_small_ref, atol=1e-5, rtol=1e-5)

    # --- 2) Larger, non-multiple shape to exercise the tiled (M, N, K) grid + padding. ---
    B2, K2, N2 = 300, 1152, 640   # -> grid (2, 2, 3) with tm=256, tn=512, tk=512
    k_w2, k_b2, k_x2 = jax.random.split(k_big, 3)
    w2 = jax.random.normal(k_w2, (N2, K2), jnp.float32) * 0.05
    b2 = jax.random.normal(k_b2, (N2,), jnp.float32)
    x2 = jax.random.normal(k_x2, (B2, K2), jnp.float32)

    y2 = jax.block_until_ready(linear_pallas(x2, w2, b2))
    y2_ref = _bf16_ref(x2, w2, b2)
    assert y2.shape == (B2, N2)
    assert jnp.allclose(y2, y2_ref, atol=2e-2, rtol=2e-2)

    print("KERNEL_OK")
</pallas_src>

<mosaic_0001>
module attributes {stable_mosaic.version = 11 : i64} {
  func.func @_linear_kernel(%arg0: i32, %arg1: i32, %arg2: i32, %arg3: memref<16x128xbf16, #tpu.memory_space<vmem>>, %arg4: memref<128x128xbf16, #tpu.memory_space<vmem>>, %arg5: memref<1x128xf32, #tpu.memory_space<vmem>>, %arg6: memref<16x128xf32, #tpu.memory_space<vmem>>, %arg7: memref<16x128xf32, #tpu.memory_space<vmem>>) attributes {dimension_semantics = [#tpu.dimension_semantics<parallel>, #tpu.dimension_semantics<parallel>, #tpu.dimension_semantics<arbitrary>], iteration_bounds = array<i64: 1, 1, 1>, scalar_prefetch = 0 : i64, scratch_operands = 1 : i64, tpu.core_type = #tpu.core_type<tc>, window_params = [{transform_indices = @transform_0, window_bounds = array<i64: 16, 128>}, {transform_indices = @transform_1, window_bounds = array<i64: 128, 128>}, {transform_indices = @transform_2, window_bounds = array<i64: 1, 128>}, {transform_indices = @transform_3, window_bounds = array<i64: 16, 128>}]} {
    %c0_i32 = arith.constant 0 : i32
    %0 = arith.cmpi eq, %arg2, %c0_i32 : i32
    %1 = arith.extui %0 : i1 to i32
    %c0_i32_0 = arith.constant 0 : i32
    %2 = arith.cmpi ne, %1, %c0_i32_0 : i32
    scf.if %2 {
      %cst_10 = arith.constant 0.000000e+00 : f32
      %12 = vector.broadcast %cst_10 : f32 to vector<16x128xf32>
      %c0_11 = arith.constant 0 : index
      %c0_12 = arith.constant 0 : index
      %13 = vector.load %arg7[%c0_11, %c0_12] : memref<16x128xf32, #tpu.memory_space<vmem>>, vector<16x128xf32>
      tpu.vector_store %arg7[%c0_11, %c0_12], %12 {strides = array<i32>} : memref<16x128xf32, #tpu.memory_space<vmem>>, vector<16x128xf32>,
    } else {
    }
    %c0 = arith.constant 0 : index
    %c0_1 = arith.constant 0 : index
    %3 = vector.load %arg7[%c0, %c0_1] : memref<16x128xf32, #tpu.memory_space<vmem>>, vector<16x128xf32>
    %c0_2 = arith.constant 0 : index
    %c0_3 = arith.constant 0 : index
    %4 = vector.load %arg3[%c0_2, %c0_3] : memref<16x128xbf16, #tpu.memory_space<vmem>>, vector<16x128xbf16>
    %c0_4 = arith.constant 0 : index
    %c0_5 = arith.constant 0 : index
    %5 = vector.load %arg4[%c0_4, %c0_5] : memref<128x128xbf16, #tpu.memory_space<vmem>>, vector<128x128xbf16>
    %cst = arith.constant dense<0.000000e+00> : vector<16x128xf32>
    %6 = tpu.matmul %4, %5, %cst {dimension_numbers = #tpu.dot_dimension_numbers<[1], [0], [0], [1], [0, 0, 1, 1], [], []>} : vector<16x128xbf16>, vector<128x128xbf16>, vector<16x128xf32> -> vector<16x128xf32>
    %7 = arith.addf %3, %6 : vector<16x128xf32>
    %c0_6 = arith.constant 0 : index
    %c0_7 = arith.constant 0 : index
    %8 = vector.load %arg7[%c0_6, %c0_7] : memref<16x128xf32, #tpu.memory_space<vmem>>, vector<16x128xf32>
    tpu.vector_store %arg7[%c0_6, %c0_7], %7 {strides = array<i32>} : memref<16x128xf32, #tpu.memory_space<vmem>>, vector<16x128xf32>,
    %c0_i32_8 = arith.constant 0 : i32
    %9 = arith.cmpi eq, %arg2, %c0_i32_8 : i32
    %10 = arith.extui %9 : i1 to i32
    %c0_i32_9 = arith.constant 0 : i32
    %11 = arith.cmpi ne, %10, %c0_i32_9 : i32
    scf.if %11 {
      %c0_10 = arith.constant 0 : index
      %c0_11 = arith.constant 0 : index
      %12 = vector.load %arg7[%c0_10, %c0_11] : memref<16x128xf32, #tpu.memory_space<vmem>>, vector<16x128xf32>
      %c0_12 = arith.constant 0 : index
      %c0_13 = arith.constant 0 : index
      %13 = vector.load %arg5[%c0_12, %c0_13] : memref<1x128xf32, #tpu.memory_space<vmem>>, vector<1x128xf32>
      %14 = vector.broadcast %13 : vector<1x128xf32> to vector<16x128xf32>
      %15 = arith.addf %12, %14 : vector<16x128xf32>
      %c0_14 = arith.constant 0 : index
      %c0_15 = arith.constant 0 : index
      %16 = vector.load %arg6[%c0_14, %c0_15] : memref<16x128xf32, #tpu.memory_space<vmem>>, vector<16x128xf32>
      tpu.vector_store %arg6[%c0_14, %c0_15], %15 {strides = array<i32>} : memref<16x128xf32, #tpu.memory_space<vmem>>, vector<16x128xf32>,
    } else {
    }
    return
  }
  func.func @transform_0(%arg0: i32, %arg1: i32, %arg2: i32) -> (i32, i32) {
    %c0_i32 = arith.constant 0 : i32
    return %arg0, %arg2 : i32, i32
  }
  func.func @transform_1(%arg0: i32, %arg1: i32, %arg2: i32) -> (i32, i32) {
    %c0_i32 = arith.constant 0 : i32
    return %arg2, %arg1 : i32, i32
  }
  func.func @transform_2(%arg0: i32, %arg1: i32, %arg2: i32) -> (i32, i32) {
    %c0_i32 = arith.constant 0 : i32
    %c0_i32_0 = arith.constant 0 : i32
    return %c0_i32, %arg1 : i32, i32
  }
  func.func @transform_3(%arg0: i32, %arg1: i32, %arg2: i32) -> (i32, i32) {
    %c0_i32 = arith.constant 0 : i32
    return %arg0, %arg1 : i32, i32
  }
}

</mosaic_0001>

<bundles_post_ra>
// kernel: tpu_custom_call.1
= control target key start
LH: loop header
LB: loop body
LE: loop exit
PB: predicated region body
PF: predicated region fallthrough
CT: control target
= control target key end

     0   :  { %8 = vsyncpa [#allocation4], 0  ;;  %s400_s0 = inlined_call_operand.hbm [shape: bf16[16,128], index: 0, kind: input, shape index: {}]   ;;  %s401_s1 = inlined_call_operand.hbm [shape: bf16[128,128], index: 1, kind: input, shape index: {}]   ;;  %s402_s2 = inlined_call_operand.vmem [shape: f32[1,128], index: 2, kind: input, shape index: {}]   ;;  %s403_s3 = inlined_call_operand.hbm [shape: f32[16,128], index: 3, kind: output, shape index: {}]  }
   0x1   :  { %9 = vsyncpa [#allocation7], 0 }
   0x2   :  { %10 = vsyncpa [#allocation5], 0  ;;  %s332_s12 = smov [#allocation3]   ;;  %s260_s16 = scalar_lea.hbm %s400_s0, 128 }
   0x3   :  { %s16_s13 = sshll.u32 %s332_s12, 4  ;;  %p261_p0 = scmp.ne.s32.totalorder %s400_s0, %s260_s16  ;;  %s17_s13 = int_to_ptr.vmem [resolvable:$true] %s16_s13 }
   0x4   :  { %p264_p1 = scmp.lt.u32.totalorder %s260_s16, %s400_s0 }
   0x6   :  { %p266_p2 = pnand %p264_p1, %p261_p0 }
   0x8   :  { %269 = shalt.err (!%p266_p2)
}
   0x9   :  { %s270_s21 = scalar_lea.vmem %s17_s13, 128  ;;  %p275_p4 = scmp.lt.s32.totalorder %s17_s13, %s17_s13 }
   0xa   :  { %p271_p3 = scmp.ne.s32.totalorder %s17_s13, %s270_s21  ;;  %p276_p5 = scmp.lt.s32.totalorder %s270_s21, %s270_s21 }
   0xc   :  { %p277_p6 = por %p276_p5, %p275_p4 }
   0xe   :  { %p278_p7 = pnand %p277_p6, %p271_p3 }
  0x10   :  { %281 = shalt.err (!%p278_p7)
}
  0x11   :  { %s333_s22 = smov 64   ;;  %s334_s23 = smov 4  }
  0x12   :  { %22 = dma.hbm_to_vmem [thread:$0]  %s400_s0, 128, %s17_s13, [#allocation4], %s333_s22, %s333_s22, %s334_s23  }
  0x13   :  { %s335_s26 = smov [#allocation6]   ;;  %s282_s30 = scalar_lea.hbm %s401_s1, 1024 }
  0x14   :  { %s28_s27 = sshll.u32 %s335_s26, 4  ;;  %p283_p8 = scmp.ne.s32.totalorder %s401_s1, %s282_s30  ;;  %s29_s27 = int_to_ptr.vmem [resolvable:$true] %s28_s27 }
  0x15   :  { %p286_p9 = scmp.lt.u32.totalorder %s282_s30, %s401_s1 }
  0x17   :  { %p288_p10 = pnand %p286_p9, %p283_p8 }
  0x19   :  { %291 = shalt.err (!%p288_p10)
}
  0x1a   :  { %s292_s8 = scalar_lea.vmem %s29_s27, 1024  ;;  %p297_p12 = scmp.lt.s32.totalorder %s29_s27, %s29_s27 }
  0x1b   :  { %p293_p11 = scmp.ne.s32.totalorder %s29_s27, %s292_s8  ;;  %p298_p13 = scmp.lt.s32.totalorder %s292_s8, %s292_s8 }
  0x1d   :  { %p299_p0 = por %p298_p13, %p297_p12 }
  0x1f   :  { %p300_p1 = pnand %p299_p0, %p293_p11 }
  0x21   :  { %303 = shalt.err (!%p300_p1)
}
  0x22   :  { %34 = dma.hbm_to_vmem [thread:$0]  %s401_s1, 1024, %s29_s27, [#allocation7], %s333_s22, %s333_s22, %s334_s23  }
  0x23   :  { %326 = dma.done.wait [#allocation4], 128  }
  0x24   :  { %327 = vsyncadd [#allocation4], 4294967168 }
  0x25   :  { %328 = dma.done.wait [#allocation7], 1024  }
  0x26   :  { %329 = vsyncadd [#allocation7], 4294966272  ;;  %v336_v0 = vmov 0.0   ;;  %vm337_vm0 = vmmov 0   ;;  %v251_v1 = vld [vmem:[#allocation6] sm:$0xff]   ;;  %v252_v2 = vld [vmem:[#allocation6 + $0x8] sm:$0xff]  }
  0x27   :  { %222 = vmatprep.subr.bf16.mxu0 %v336_v0  ;;  %238 = vmatprep.mubr.msk.bf16.mxu0 %vm337_vm0, %v336_v0  ;;  %v253_v3 = vld [vmem:[#allocation6 + $0x10] sm:$0xff]   ;;  %v254_v4 = vld [vmem:[#allocation6 + $0x18] sm:$0xff]   ;;  %v255_v5 = vld [vmem:[#allocation6 + $0x20] sm:$0xff]   ;;  %s338_s11 = smov [#allocation8]  }
  0x28   :  { %223 = vmatpush3.bf16.msra.mxu0 %v251_v1  ;;  %v256_v6 = vld [vmem:[#allocation6 + $0x28] sm:$0xff]   ;;  %v257_v7 = vld [vmem:[#allocation6 + $0x30] sm:$0xff]   ;;  %v258_v8 = vld [vmem:[#allocation6 + $0x38] sm:$0xff]   ;;  %s190_s12 = sshll.u32 %s338_s11, 4  ;;  %s191_s12 = int_to_ptr.vmem [resolvable:$true] %s190_s12 }
  0x29   :  { %224 = vmatprep.subr.bf16.mxu0 %v336_v0  ;;  %v259_v9 = vld [vmem:[#allocation3] sm:$0xff]   ;;  %s304_s13 = scalar_lea.vmem %s191_s12, 256  ;;  %p309_p3 = scmp.lt.s32.totalorder %s191_s12, %s191_s12 }
  0x2a   :  { %v212_v10 = vld [vmem:[%s402_s2] ss:$0 sm:$0xff]  ;;  %p305_p2 = scmp.ne.s32.totalorder %s191_s12, %s304_s13  ;;  %p310_p4 = scmp.lt.s32.totalorder %s304_s13, %s304_s13 }
  0x2c   :  { %225 = vmatpush3.bf16.msra.mxu0 %v252_v2  ;;  %p311_p5 = por %p310_p4, %p309_p3 }
  0x2d   :  { %226 = vmatprep.subr.bf16.mxu0 %v336_v0 }
  0x2e   :  { %p312_p6 = pnand %p311_p5, %p305_p2 }
  0x30   :  { %227 = vmatpush3.bf16.msra.mxu0 %v253_v3 }
  0x31   :  { %228 = vmatprep.subr.bf16.mxu0 %v336_v0 }
  0x34   :  { %229 = vmatpush3.bf16.msra.mxu0 %v254_v4 }
  0x35   :  { %230 = vmatprep.subr.bf16.mxu0 %v336_v0 }
  0x38   :  { %231 = vmatpush3.bf16.msra.mxu0 %v255_v5 }
  0x39   :  { %232 = vmatprep.subr.bf16.mxu0 %v336_v0 }
  0x3c   :  { %233 = vmatpush3.bf16.msra.mxu0 %v256_v6 }
  0x3d   :  { %234 = vmatprep.subr.bf16.mxu0 %v336_v0 }
  0x40   :  { %235 = vmatpush3.bf16.msra.mxu0 %v257_v7 }
  0x41   :  { %236 = vmatprep.subr.bf16.mxu0 %v336_v0 }
  0x44   :  { %237 = vmatpush3.bf16.msra.mxu0 %v258_v8 }
  0x47   :  { %239 = vmatmul.mubr.bf16.vlgmr.msra.gmra.mrb[0].mxu0 %v259_v9 }
 0x11a   :  { %v158_v11 = vpop.f32.mrb[0].mxu0 }
 0x11b   :  { %v181_v12 = vadd.f32 %v212_v10, %v158_v11  ;;  %v240_v13 = vpop.f32.mrb[1].mxu0 }
 0x11c   :  { %v161_v14 = vpop.f32.mrb[2].mxu0 }
 0x11d   :  { %183 = vst [vmem:[#allocation8] sm:$0xff] %v181_v12  ;;  %v182_v15 = vadd.f32 %v212_v10, %v161_v14  ;;  %v241_v16 = vpop.f32.mrb[3].mxu0 }
 0x11f   :  { %184 = vst [vmem:[#allocation8 + $0x8] sm:$0xff] %v182_v15 }
 0x120   :  { %315 = shalt.err (!%p312_p6)
}
 0x121   :  { %s316_s15 = scalar_lea.hbm %s403_s3, 256 }
 0x122   :  { %p317_p7 = scmp.ne.s32.totalorder %s403_s3, %s316_s15  ;;  %p320_p8 = scmp.lt.u32.totalorder %s316_s15, %s403_s3 }
 0x124   :  { %p322_p9 = pnand %p320_p8, %p317_p7 }
 0x126   :  { %325 = shalt.err (!%p322_p9)
}
 0x127   :  { %s339_s20 = smov 128   ;;  %s340_s21 = smov 8  }
 0x128   :  { %196 = dma.vmem_to_hbm [thread:$0]  %s191_s12, 256, %s403_s3, [#allocation5], %s339_s20, %s339_s20, %s340_s21  }
 0x129   :  { %330 = dma.done.wait [#allocation5], 256  }
 0x12a   :  { %331 = vsyncadd [#allocation5], 4294967040 }
 0x12b   :  { %200 = vsyncpa [#allocation4], 1 }
 0x12c   :  { %201 = vsyncpa [#allocation7], 1 }
 0x12d   :  { %202 = vsyncpa [#allocation5], 1 }

</bundles_post_ra>
